<compile_context>
chip_gen: v7x
topology: tpu7x:2x2x1
jax: 0.10.0
libtpu: 0.0.40
codegen_flags: <defaults>
</compile_context>

<pallas_src>
import functools

import jax
import jax.numpy as jnp
from jax.experimental import pallas as pl
from jax.experimental.pallas import tpu as pltpu


# ---------------------------------------------------------------------------
# Kernel bodies
# ---------------------------------------------------------------------------
def _forward_block(x, w1, b1, w2, b2, mask):
    # fc1 + ReLU: bf16 MXU inputs, f32 accumulate.
    h = jnp.dot(x, w1, preferred_element_type=jnp.float32) + b1
    h = jnp.maximum(h, 0.0)

    # Dropout(p=0.5): mask holds 0.0 (dropped) or 2.0 (kept, scaled by 1/(1-p)).
    if mask is not None:
        h = h * mask

    # fc2: feed bf16 to the MXU, accumulate in f32.
    logits = jnp.dot(h.astype(w2.dtype), w2,
                     preferred_element_type=jnp.float32) + b2

    # log_softmax over the class axis (dim=1), max-shifted, all f32.
    m = jnp.max(logits, axis=1, keepdims=True)
    shifted = logits - m
    lse = jnp.log(jnp.sum(jnp.exp(shifted), axis=1, keepdims=True))
    return shifted - lse


def _kernel_eval(x_ref, w1_ref, b1_ref, w2_ref, b2_ref, out_ref):
    out = _forward_block(x_ref[...], w1_ref[...], b1_ref[...],
                         w2_ref[...], b2_ref[...], mask=None)
    out_ref[...] = out.astype(out_ref.dtype)


def _kernel_train(x_ref, w1_ref, b1_ref, w2_ref, b2_ref, mask_ref, out_ref):
    out = _forward_block(x_ref[...], w1_ref[...], b1_ref[...],
                         w2_ref[...], b2_ref[...], mask=mask_ref[...])
    out_ref[...] = out.astype(out_ref.dtype)


# ---------------------------------------------------------------------------
# Wrapper
# ---------------------------------------------------------------------------
_MAX_TB = 8192  # rows per grid step; safe for default scoped VMEM on v5e/v6e/v7x


def _round_up(n, m):
    return ((n + m - 1) // m) * m


def simplenet_forward(x, params, *, key=None, training=False):
    """x: (B, 64) float32 -> (B, 10) float32 log-probs (forward of SimpleNet)."""
    w1, b1, w2, b2 = params
    B, F_in = x.shape
    assert F_in == 64

    # Batch tiling: TB multiple of 8 (sublane), capped so double-buffered tiles
    # fit comfortably in scoped VMEM on every TPU generation.
    tb = min(_MAX_TB, _round_up(B, 8))
    bp = _round_up(B, tb)
    grid = (bp // tb,)

    # Pad batch to a multiple of the tile (padded rows are discarded at the end).
    x_p = x if bp == B else jnp.pad(x, ((0, bp - B), (0, 0)))

    # MXU operands in bf16 (halves the dominant x HBM read); biases stay f32.
    x_bf = x_p.astype(jnp.bfloat16)                              # (bp, 64)
    w1_t = jnp.asarray(w1).T.astype(jnp.bfloat16)                # (64, 32)
    w2_t = jnp.asarray(w2).T.astype(jnp.bfloat16)                # (32, 10)
    b1_2d = jnp.asarray(b1, jnp.float32).reshape(1, -1)          # (1, 32)
    b2_2d = jnp.asarray(b2, jnp.float32).reshape(1, -1)          # (1, 10)

    const = lambda i: (0, 0)  # weights/biases stay VMEM-resident, DMA'd once
    in_specs = [
        pl.BlockSpec((tb, 64), lambda i: (i, 0)),     # x tile
        pl.BlockSpec((64, 32), const),                # w1^T
        pl.BlockSpec((1, 32), const),                 # b1
        pl.BlockSpec((32, 10), const),                # w2^T
        pl.BlockSpec((1, 10), const),                 # b2
    ]
    inputs = [x_bf, w1_t, b1_2d, w2_t, b2_2d]
    bytes_accessed = bp * (64 * 2 + 10 * 4) + (64 * 32 + 32 * 10) * 2 + (32 + 10) * 4

    if training:
        if key is None:
            key = jax.random.PRNGKey(0)
        # Dropout keep/scale mask: 0.0 with prob 0.5, 2.0 (=1/(1-p)) with prob 0.5.
        keep = jax.random.bernoulli(key, p=0.5, shape=(bp, 32))
        mask = keep.astype(jnp.float32) * 2.0
        in_specs.append(pl.BlockSpec((tb, 32), lambda i: (i, 0)))
        inputs.append(mask)
        bytes_accessed += bp * 32 * 4
        kernel = _kernel_train
    else:
        kernel = _kernel_eval

    cost = pl.CostEstimate(
        flops=bp * 2 * (64 * 32 + 32 * 10),
        transcendentals=bp * 10,
        bytes_accessed=bytes_accessed,
    )

    out_p = pl.pallas_call(
        kernel,
        out_shape=jax.ShapeDtypeStruct((bp, 10), jnp.float32),
        grid=grid,
        in_specs=in_specs,
        out_specs=pl.BlockSpec((tb, 10), lambda i: (i, 0)),
        compiler_params=pltpu.CompilerParams(
            dimension_semantics=("parallel",)),
        cost_estimate=cost,
    )(*inputs)

    return out_p[:B] if bp != B else out_p


# ---------------------------------------------------------------------------
# Param init (mirrors nn.Linear's U(-1/sqrt(fan_in), +1/sqrt(fan_in)))
# ---------------------------------------------------------------------------
def init_params(key):
    k1, k2, k3, k4 = jax.random.split(key, 4)
    bound1 = 1.0 / jnp.sqrt(64.0)
    bound2 = 1.0 / jnp.sqrt(32.0)
    w1 = jax.random.uniform(k1, (32, 64), jnp.float32, -bound1, bound1)  # (out, in)
    b1 = jax.random.uniform(k2, (32,),    jnp.float32, -bound1, bound1)
    w2 = jax.random.uniform(k3, (10, 32), jnp.float32, -bound2, bound2)  # (out, in)
    b2 = jax.random.uniform(k4, (10,),    jnp.float32, -bound2, bound2)
    return (w1, b1, w2, b2)


# ---------------------------------------------------------------------------
# Self-test
# ---------------------------------------------------------------------------
if __name__ == "__main__":
    key = jax.random.PRNGKey(0)
    pkey, xkey, dkey = jax.random.split(key, 3)
    params = init_params(pkey)
    w1, b1, w2, b2 = params

    B = 8
    x = jax.random.normal(xkey, (B, 64), jnp.float32)

    # Reference with the same bf16 rounding of the MXU operands, math in f32.
    def ref_forward(x_in, mask=None):
        xb = x_in.astype(jnp.bfloat16).astype(jnp.float32)
        w1b = w1.T.astype(jnp.bfloat16).astype(jnp.float32)
        w2b = w2.T.astype(jnp.bfloat16).astype(jnp.float32)
        h = jnp.maximum(xb @ w1b + b1, 0.0)
        if mask is not None:
            h = h * mask
        hb = h.astype(jnp.bfloat16).astype(jnp.float32)
        logits = hb @ w2b + b2
        return jax.nn.log_softmax(logits, axis=1)

    # Eval mode (dropout is identity, matching module.eval()).
    out_eval = jax.block_until_ready(simplenet_forward(x, params, training=False))
    assert out_eval.shape == (B, 10)
    assert jnp.allclose(out_eval, ref_forward(x), atol=1e-3, rtol=1e-3)
    # log-probs should sum to ~1 in prob space.
    assert jnp.allclose(jnp.sum(jnp.exp(out_eval), axis=1), 1.0, atol=1e-4)

    # Training mode: same explicit dropout mask inside and outside the kernel.
    keep = jax.random.bernoulli(dkey, p=0.5, shape=(B, 32))
    mask = keep.astype(jnp.float32) * 2.0
    out_train = jax.block_until_ready(
        simplenet_forward(x, params, key=dkey, training=True))
    assert out_train.shape == (B, 10)
    assert jnp.allclose(out_train, ref_forward(x, mask), atol=1e-3, rtol=1e-3)

    print("KERNEL_OK")
</pallas_src>

<mosaic_0001>
module attributes {stable_mosaic.version = 11 : i64} {
  func.func @_kernel_eval(%arg0: i32, %arg1: memref<8x64xbf16, #tpu.memory_space<vmem>>, %arg2: memref<64x32xbf16, #tpu.memory_space<vmem>>, %arg3: memref<1x32xf32, #tpu.memory_space<vmem>>, %arg4: memref<32x10xbf16, #tpu.memory_space<vmem>>, %arg5: memref<1x10xf32, #tpu.memory_space<vmem>>, %arg6: memref<8x10xf32, #tpu.memory_space<vmem>>) attributes {dimension_semantics = [#tpu.dimension_semantics<parallel>], iteration_bounds = array<i64: 1>, scalar_prefetch = 0 : i64, scratch_operands = 0 : i64, tpu.core_type = #tpu.core_type<tc>, window_params = [{transform_indices = @transform_0, window_bounds = array<i64: 8, 64>}, {pipeline_mode = #tpu.pipeline_mode<synchronous>, transform_indices = @transform_1, window_bounds = array<i64: 64, 32>}, {pipeline_mode = #tpu.pipeline_mode<synchronous>, transform_indices = @transform_2, window_bounds = array<i64: 1, 32>}, {pipeline_mode = #tpu.pipeline_mode<synchronous>, transform_indices = @transform_3, window_bounds = array<i64: 32, 10>}, {pipeline_mode = #tpu.pipeline_mode<synchronous>, transform_indices = @transform_4, window_bounds = array<i64: 1, 10>}, {transform_indices = @transform_5, window_bounds = array<i64: 8, 10>}]} {
    %c0 = arith.constant 0 : index
    %c0_0 = arith.constant 0 : index
    %0 = vector.load %arg1[%c0, %c0_0] : memref<8x64xbf16, #tpu.memory_space<vmem>>, vector<8x64xbf16>
    %c0_1 = arith.constant 0 : index
    %c0_2 = arith.constant 0 : index
    %1 = vector.load %arg2[%c0_1, %c0_2] : memref<64x32xbf16, #tpu.memory_space<vmem>>, vector<64x32xbf16>
    %c0_3 = arith.constant 0 : index
    %c0_4 = arith.constant 0 : index
    %2 = vector.load %arg3[%c0_3, %c0_4] : memref<1x32xf32, #tpu.memory_space<vmem>>, vector<1x32xf32>
    %c0_5 = arith.constant 0 : index
    %c0_6 = arith.constant 0 : index
    %3 = vector.load %arg4[%c0_5, %c0_6] : memref<32x10xbf16, #tpu.memory_space<vmem>>, vector<32x10xbf16>
    %c0_7 = arith.constant 0 : index
    %c0_8 = arith.constant 0 : index
    %4 = vector.load %arg5[%c0_7, %c0_8] : memref<1x10xf32, #tpu.memory_space<vmem>>, vector<1x10xf32>
    %cst = arith.constant dense<0.000000e+00> : vector<8x32xf32>
    %5 = tpu.matmul %0, %1, %cst {dimension_numbers = #tpu.dot_dimension_numbers<[1], [0], [0], [1], [0, 0, 1, 1], [], []>} : vector<8x64xbf16>, vector<64x32xbf16>, vector<8x32xf32> -> vector<8x32xf32>
    %6 = vector.broadcast %2 : vector<1x32xf32> to vector<8x32xf32>
    %7 = arith.addf %5, %6 : vector<8x32xf32>
    %cst_9 = arith.constant 0.000000e+00 : f32
    %8 = vector.broadcast %cst_9 : f32 to vector<8x32xf32>
    %9 = arith.maximumf %7, %8 : vector<8x32xf32>
    %10 = arith.truncf %9 : vector<8x32xf32> to vector<8x32xbf16>
    %cst_10 = arith.constant dense<0.000000e+00> : vector<8x10xf32>
    %11 = tpu.matmul %10, %3, %cst_10 {dimension_numbers = #tpu.dot_dimension_numbers<[1], [0], [0], [1], [0, 0, 1, 1], [], []>} : vector<8x32xbf16>, vector<32x10xbf16>, vector<8x10xf32> -> vector<8x10xf32>
    %12 = vector.broadcast %4 : vector<1x10xf32> to vector<8x10xf32>
    %13 = arith.addf %11, %12 : vector<8x10xf32>
    %cst_11 = arith.constant dense<0xFF800000> : vector<8xf32>
    %14 = vector.multi_reduction <maximumf>, %13, %cst_11 [1] : vector<8x10xf32> to vector<8xf32>
    %15 = vector.shape_cast %14 : vector<8xf32> to vector<8x1xf32>
    %16 = vector.broadcast %15 : vector<8x1xf32> to vector<8x10xf32>
    %17 = arith.subf %13, %16 : vector<8x10xf32>
    %18 = math.exp %17 : vector<8x10xf32>
    %cst_12 = arith.constant dense<0.000000e+00> : vector<8xf32>
    %19 = vector.multi_reduction <add>, %18, %cst_12 [1] : vector<8x10xf32> to vector<8xf32>
    %20 = vector.shape_cast %19 : vector<8xf32> to vector<8x1xf32>
    %21 = math.log %20 : vector<8x1xf32>
    %22 = vector.broadcast %21 : vector<8x1xf32> to vector<8x10xf32>
    %23 = arith.subf %17, %22 : vector<8x10xf32>
    %c0_13 = arith.constant 0 : index
    %c0_14 = arith.constant 0 : index
    %24 = vector.load %arg6[%c0_13, %c0_14] : memref<8x10xf32, #tpu.memory_space<vmem>>, vector<8x10xf32>
    tpu.vector_store %arg6[%c0_13, %c0_14], %23 {strides = array<i32>} : memref<8x10xf32, #tpu.memory_space<vmem>>, vector<8x10xf32>,
    return
  }
  func.func @transform_0(%arg0: i32) -> (i32, i32) {
    %c0_i32 = arith.constant 0 : i32
    %c0_i32_0 = arith.constant 0 : i32
    return %arg0, %c0_i32 : i32, i32
  }
  func.func @transform_1(%arg0: i32) -> (i32, i32) {
    %c0_i32 = arith.constant 0 : i32
    %c0_i32_0 = arith.constant 0 : i32
    %c0_i32_1 = arith.constant 0 : i32
    return %c0_i32, %c0_i32_0 : i32, i32
  }
  func.func @transform_2(%arg0: i32) -> (i32, i32) {
    %c0_i32 = arith.constant 0 : i32
    %c0_i32_0 = arith.constant 0 : i32
    %c0_i32_1 = arith.constant 0 : i32
    return %c0_i32, %c0_i32_0 : i32, i32
  }
  func.func @transform_3(%arg0: i32) -> (i32, i32) {
    %c0_i32 = arith.constant 0 : i32
    %c0_i32_0 = arith.constant 0 : i32
    %c0_i32_1 = arith.constant 0 : i32
    return %c0_i32, %c0_i32_0 : i32, i32
  }
  func.func @transform_4(%arg0: i32) -> (i32, i32) {
    %c0_i32 = arith.constant 0 : i32
    %c0_i32_0 = arith.constant 0 : i32
    %c0_i32_1 = arith.constant 0 : i32
    return %c0_i32, %c0_i32_0 : i32, i32
  }
  func.func @transform_5(%arg0: i32) -> (i32, i32) {
    %c0_i32 = arith.constant 0 : i32
    %c0_i32_0 = arith.constant 0 : i32
    return %arg0, %c0_i32 : i32, i32
  }
}

</mosaic_0001>

<bundles_post_ra>
// kernel: tpu_custom_call.1
= control target key start
LH: loop header
LB: loop body
LE: loop exit
PB: predicated region body
PF: predicated region fallthrough
CT: control target
= control target key end

     0   :  { %v278_v1 = vmov 0.0   ;;  %vm279_vm0 = vmmov 0   ;;  %s353_s0 = inlined_call_operand.vmem [shape: bf16[8,64], index: 0, kind: input, shape index: {}]   ;;  %s354_s1 = inlined_call_operand.vmem [shape: bf16[64,32], index: 1, kind: input, shape index: {}]   ;;  %s355_s2 = inlined_call_operand.vmem [shape: f32[1,32], index: 2, kind: input, shape index: {}]   ;;  %s356_s3 = inlined_call_operand.vmem [shape: bf16[32,10], index: 3, kind: input, shape index: {}]   ;;  %s357_s4 = inlined_call_operand.vmem [shape: f32[1,10], index: 4, kind: input, shape index: {}]   ;;  %s358_s5 = inlined_call_operand.hbm [shape: f32[8,10], index: 5, kind: output, shape index: {}]  }
   0x1   :  { %v244_v0 = vld [vmem:[%s354_s1] sm:$0xff]   ;;  %221 = vmatprep.subr.bf16.mxu0 %v278_v1  ;;  %233 = vmatprep.subr.bf16.mxu1 %v278_v1  ;;  %v245_v2 = vld [vmem:[%s354_s1 + $0x8] sm:$0xff]   ;;  %v246_v3 = vld [vmem:[%s354_s1 + $0x10] sm:$0xff]  }
   0x2   :  { %222 = vmatpush3.bf16.msra.mxu0 %v244_v0  ;;  %229 = vmatprep.mubr.msk.bf16.mxu0 %vm279_vm0, %v278_v1 }
   0x3   :  { %223 = vmatprep.subr.bf16.mxu0 %v278_v1  ;;  %237 = vmatprep.mubr.msk.bf16.mxu1 %vm279_vm0, %v278_v1 }
   0x6   :  { %224 = vmatpush3.bf16.msra.mxu0 %v245_v2 }
   0x7   :  { %10 = vsyncpa [#allocation3], 0  ;;  %225 = vmatprep.subr.bf16.mxu0 %v278_v1  ;;  %v247_v4 = vld [vmem:[%s354_s1 + $0x18] sm:$0xff]   ;;  %v22_v5 = vld [vmem:[%s353_s0] sm:$0xf]  ;;  %vm67_vm1 = vcmask 523264  }
   0x8   :  { %v248_v6 = vld [vmem:[%s356_s3] sm:$0xff]   ;;  %v249_v7 = vld [vmem:[%s356_s3 + $0x8] sm:$0xff]   ;;  %vm131_vm2 = vcmask 261120   ;;  %vm175_vm3 = vcmask 80896  }
   0x9   :  { %234 = vmatpush3.bf16.msra.mxu1 %v248_v6  ;;  %v203_v8 = vld [vmem:[%s355_s2] ss:$0 sm:$0xff]  ;;  %s280_s2 = smov [#allocation2]  }
   0xa   :  { %226 = vmatpush3.bf16.msra.mxu0 %v246_v3  ;;  %235 = vmatprep.subr.bf16.mxu1 %v278_v1  ;;  %v209_v16 = vld [vmem:[%s357_s4] ss:$0 sm:$0xff]  ;;  %s195_s3 = sshll.u32 %s280_s2, 4  ;;  %s196_s3 = int_to_ptr.vmem [resolvable:$true] %s195_s3 }
   0xb   :  { %227 = vmatprep.subr.bf16.mxu0 %v278_v1  ;;  %s254_s4 = scalar_lea.vmem %s196_s3, 128  ;;  %p259_p1 = scmp.lt.s32.totalorder %s196_s3, %s196_s3 }
   0xc   :  { %p255_p0 = scmp.ne.s32.totalorder %s196_s3, %s254_s4  ;;  %p260_p2 = scmp.lt.s32.totalorder %s254_s4, %s254_s4 }
   0xd   :  { %236 = vmatpush3.bf16.msra.mxu1 %v249_v7 }
   0xe   :  { %228 = vmatpush3.bf16.msra.mxu0 %v247_v4  ;;  %p261_p3 = por %p260_p2, %p259_p1 }
  0x10   :  { %p262_p4 = pnand %p261_p3, %p255_p0 }
  0x11   :  { %230 = vmatmul.mubr.msk.bf16.vlgmr.msra.gmra.mrb[0].mxu0 %vm67_vm1, %v22_v5 }
  0xe4   :  { %v105_v9 = vpop.f32.mrb[0].mxu0 }
  0xe5   :  { %v106_v10 = vadd.f32 %v203_v8, %v105_v9  ;;  %v231_v11 = vpop.f32.mrb[1].mxu0 }
  0xe6   :  { %v108_v12 = vpop.f32.mrb[2].mxu0 }
  0xe7   :  { %v111_v13 = vmax.f32 %v106_v10, 0.0  ;;  %v232_v14 = vpop.f32.mrb[3].mxu0 }
  0xe9   :  { %v112_v15 = vpack.c.bf16 %v111_v13, %v111_v13 }
  0xeb   :  { %238 = vmatmul.mubr.msk.bf16.vlgmr.msra.gmra.mrb[0].mxu1 %vm131_vm2, %v112_v15 }
 0x1be   :  { %v169_v17 = vpop.f32.mrb[0].mxu1 }
 0x1bf   :  { %v170_v18 = vadd.f32 %v209_v16, %v169_v17  ;;  %v239_v19 = vpop.f32.mrb[1].mxu1 }
 0x1c0   :  { %v172_v20 = vpop.f32.mrb[2].mxu1 }
 0x1c1   :  { %v240_v21 = vpop.f32.mrb[3].mxu1  ;;  %v176_v22 = vsel %vm175_vm3, %v170_v18, -inf }
 0x1c2   :  { %177 = vmax.xlane.f32.xlu0 %v176_v22 }
 0x24f   :  { %v178_v23 = vpop.xlane.xlu0 %177 }
 0x250   :  { %v179_v24 = vsub.f32 %v170_v18, %v178_v23 }
 0x252   :  { %v180_v25 = vmul.f32 1.442695, %v179_v24 }
 0x254   :  { %250 = vpow2.f32 %v180_v25 }
 0x25e   :  { %v251_v26 = vpop.eup %250 }
 0x25f   :  { %v182_v27 = vsel %vm175_vm3, %v251_v26, 0.0 }
 0x260   :  { %183 = vadd.xlane.f32.xlu0 %v182_v27 }
 0x2ed   :  { %v184_v28 = vpop.xlane.xlu0 %183 }
 0x2ee   :  { %252 = vlog2.f32 %v184_v28 }
 0x2f8   :  { %v253_v29 = vpop.eup %252 }
 0x2f9   :  { %v186_v30 = vmul.f32 0.6931472, %v253_v29 }
 0x2fb   :  { %v187_v31 = vsub.f32 %v179_v24, %v186_v30 }
 0x2fd   :  { %188 = vst.msk [vmem:[#allocation2] sm:$0xff] %vm175_vm3, %v187_v31 }
 0x2fe   :  { %265 = shalt.err (!%p262_p4)
}
 0x2ff   :  { %s266_s11 = scalar_lea.hbm %s358_s5, 128 }
 0x300   :  { %p267_p5 = scmp.ne.s32.totalorder %s358_s5, %s266_s11  ;;  %p270_p6 = scmp.lt.u32.totalorder %s266_s11, %s358_s5 }
 0x302   :  { %p272_p7 = pnand %p270_p6, %p267_p5 }
 0x304   :  { %275 = shalt.err (!%p272_p7)
}
 0x305   :  { %198 = dma.vmem_to_hbm [thread:$0]  %s196_s3, 128, %s358_s5, [#allocation3]  }
 0x306   :  { %276 = dma.done.wait [#allocation3], 128  }
 0x307   :  { %277 = vsyncadd [#allocation3], 4294967168 }
 0x308   :  { %202 = vsyncpa [#allocation3], 1 }

</bundles_post_ra>
